<compile_context>
chip_gen: v5e
topology: v5e:2x2
jax: 0.10.0
libtpu: 0.0.40
codegen_flags: <defaults>
</compile_context>

<pallas_src>
import math

import jax
import jax.numpy as jnp
from jax.experimental import pallas as pl
from jax.experimental.pallas import tpu as pltpu

BN_EPS = 1e-5     # nn.BatchNorm1d default eps
FC_SIZE = 256     # Head fc_size
NUM_PIECES = 7    # x1, y1, x1*y1, x2, y2, x2*y2, gathered-token  -> 7*H features
OUT_PAD = 128     # lane-dense padded output width (real logits are [:, :3])

ENC_TILE_M = 512  # encoder row tile (keeps VMEM bounded for realistic B*S*H)
HEAD_TILE_B = 256 # head batch-row tile


def _round_up(x, m):
    return (x + m - 1) // m * m


# ---------------------------------------------------------------------------
# Stand-in token encoder kernel (row-tiled dense + tanh).
# TODO(synk): BertModel.from_pretrained (pretrained multi-layer transformer with
# attention mask / output_all_encoded_layers) plus torch.utils.checkpoint has no
# clean in-script Pallas equivalent; replaced by embedding lookup + one Pallas
# dense+tanh layer producing "bert_outputs" of shape [B, S, H].
# ---------------------------------------------------------------------------
def _encoder_kernel(emb_ref, w_ref, b_ref, out_ref):
    out_ref[...] = jnp.tanh(
        jnp.dot(emb_ref[...], w_ref[...], preferred_element_type=jnp.float32)
        + b_ref[...]
    )


def encoder_forward(emb_2d, w, b):
    rows, H = emb_2d.shape
    rows_pad = _round_up(rows, 8)
    tile = min(ENC_TILE_M, rows_pad)
    rows_pad = _round_up(rows_pad, tile)
    if rows_pad != rows:
        emb_2d = jnp.pad(emb_2d, ((0, rows_pad - rows), (0, 0)))

    grid = (rows_pad // tile,)
    cost = pl.CostEstimate(
        flops=2 * rows_pad * H * H,
        transcendentals=rows_pad * H,
        bytes_accessed=4 * (2 * rows_pad * H + H * H + H),
    )
    out = pl.pallas_call(
        _encoder_kernel,
        out_shape=jax.ShapeDtypeStruct((rows_pad, H), jnp.float32),
        grid=grid,
        in_specs=[
            pl.BlockSpec((tile, H), lambda i: (i, 0)),   # activations: row-tiled
            pl.BlockSpec((H, H), lambda i: (0, 0)),      # weight: resident
            pl.BlockSpec((1, H), lambda i: (0, 0)),      # bias: resident
        ],
        out_specs=pl.BlockSpec((tile, H), lambda i: (i, 0)),
        compiler_params=pltpu.CompilerParams(
            dimension_semantics=("parallel",)),
        cost_estimate=cost,
    )(emb_2d, w, b)
    return out[:rows]


# ---------------------------------------------------------------------------
# Head kernel: eval-mode MLP with BatchNorms pre-folded into the Linears.
# One batch-row-tiled chain of 4 MXU matmuls + ReLUs; output is lane-dense
# (128 wide), real logits are columns [:3].
# ---------------------------------------------------------------------------
def _head_kernel(feat_ref, w1_ref, b1_ref, w2_ref, b2_ref,
                 w3_ref, b3_ref, w4_ref, b4_ref, out_ref):
    h = jnp.maximum(
        jnp.dot(feat_ref[...], w1_ref[...], preferred_element_type=jnp.float32)
        + b1_ref[...], 0.0)
    h = jnp.maximum(
        jnp.dot(h, w2_ref[...], preferred_element_type=jnp.float32)
        + b2_ref[...], 0.0)
    h = jnp.maximum(
        jnp.dot(h, w3_ref[...], preferred_element_type=jnp.float32)
        + b3_ref[...], 0.0)
    out_ref[...] = (
        jnp.dot(h, w4_ref[...], preferred_element_type=jnp.float32) + b4_ref[...])


def _fold_bn_linear(gamma, beta, mean, var, w, b):
    """Fold eval-mode BatchNorm1d (y = (x-mean)*gamma/sqrt(var+eps)+beta)
    followed by Linear (y @ w + b) into a single affine:  x @ w' + b'."""
    scale = gamma * jax.lax.rsqrt(var + BN_EPS)
    shift = beta - mean * scale
    w_f = w * scale[:, None]
    b_f = b + shift @ w
    return w_f, b_f


def head_forward(params, feat):
    B, F7 = feat.shape

    # Fold the four BatchNorms into the four Linears (eval-mode semantics;
    # Dropout(0.5) is identity in eval).
    w1, b1 = _fold_bn_linear(params["bn1_g"], params["bn1_b"], params["bn1_m"],
                             params["bn1_v"], params["w1"], params["b1"])
    w2, b2 = _fold_bn_linear(params["bn2_g"], params["bn2_b"], params["bn2_m"],
                             params["bn2_v"], params["w2"], params["b2"])
    w3, b3 = _fold_bn_linear(params["bn3_g"], params["bn3_b"], params["bn3_m"],
                             params["bn3_v"], params["w3"], params["b3"])
    w4, b4 = _fold_bn_linear(params["bn4_g"], params["bn4_b"], params["bn4_m"],
                             params["bn4_v"], params["w4"], params["b4"])

    # Lane-dense output: pad the 3-wide classifier to 128 lanes.
    w4p = jnp.zeros((FC_SIZE, OUT_PAD), jnp.float32).at[:, :3].set(w4)
    b4p = jnp.zeros((1, OUT_PAD), jnp.float32).at[:, :3].set(b4)

    # Pad / tile the batch dimension.
    b_pad = _round_up(B, 8)
    bt = min(HEAD_TILE_B, b_pad)
    b_pad = _round_up(b_pad, bt)
    if b_pad != B:
        feat = jnp.pad(feat, ((0, b_pad - B), (0, 0)))

    args = (feat, w1, b1.reshape(1, -1), w2, b2.reshape(1, -1),
            w3, b3.reshape(1, -1), w4p, b4p)
    in_specs = [
        pl.BlockSpec((bt, F7), lambda i: (i, 0)),               # features: row-tiled
        pl.BlockSpec((F7, FC_SIZE), lambda i: (0, 0)),          # w1
        pl.BlockSpec((1, FC_SIZE), lambda i: (0, 0)),           # b1
        pl.BlockSpec((FC_SIZE, FC_SIZE), lambda i: (0, 0)),     # w2
        pl.BlockSpec((1, FC_SIZE), lambda i: (0, 0)),           # b2
        pl.BlockSpec((FC_SIZE, FC_SIZE), lambda i: (0, 0)),     # w3
        pl.BlockSpec((1, FC_SIZE), lambda i: (0, 0)),           # b3
        pl.BlockSpec((FC_SIZE, OUT_PAD), lambda i: (0, 0)),     # w4 (padded)
        pl.BlockSpec((1, OUT_PAD), lambda i: (0, 0)),           # b4 (padded)
    ]
    out = pl.pallas_call(
        _head_kernel,
        out_shape=jax.ShapeDtypeStruct((b_pad, OUT_PAD), jnp.float32),
        grid=(b_pad // bt,),
        in_specs=in_specs,
        out_specs=pl.BlockSpec((bt, OUT_PAD), lambda i: (i, 0)),
        compiler_params=pltpu.CompilerParams(
            dimension_semantics=("parallel",)),
    )(*args)
    return out[:B, :3]


# ---------------------------------------------------------------------------
# Full forward (glue in plain JAX, hot paths in Pallas).
# ---------------------------------------------------------------------------
def gap_model_forward(params, token_tensor, offsets):
    B, S = token_tensor.shape
    H = params["emb"].shape[1]

    # Glue: embedding lookup + positional embedding; mask out padding (id 0)
    # in lieu of BERT's attention_mask = (token_tensor > 0).
    emb = params["emb"][token_tensor] + params["pos"][None, :, :]
    emb = emb * (token_tensor > 0)[..., None].astype(jnp.float32)

    # Pallas stand-in encoder -> "bert_outputs".
    # TODO(synk): for the (token-independent) stand-in encoder, one could
    # encode only the 5 gathered rows per batch; kept full-sequence for
    # structural fidelity to the real attention encoder.
    enc = encoder_forward(emb.reshape(B * S, H), params["enc_w"], params["enc_b"])
    bert_outputs = enc.reshape(B, S, H)

    # Head glue: dynamic gathers (span endpoints + extra token), then a single
    # concatenated (B, 7H) feature matrix handed to the Pallas head kernel.
    spans = offsets[:, :4].reshape(B, 2, 2)
    bidx = jnp.arange(B)
    x1 = bert_outputs[bidx, spans[:, 0, 0]]
    y1 = bert_outputs[bidx, spans[:, 0, 1]]
    x2 = bert_outputs[bidx, spans[:, 1, 0]]
    y2 = bert_outputs[bidx, spans[:, 1, 1]]
    g = bert_outputs[bidx, offsets[:, 4]]
    feat = jnp.concatenate([x1, y1, x1 * y1, x2, y2, x2 * y2, g], axis=-1)

    return head_forward(params, feat)


# Pure-JAX reference of the exact same math (unfolded BN), for correctness.
def reference_forward(params, token_tensor, offsets):
    B, S = token_tensor.shape
    H = params["emb"].shape[1]
    emb = params["emb"][token_tensor] + params["pos"][None, :, :]
    emb = emb * (token_tensor > 0)[..., None].astype(jnp.float32)
    enc = jnp.tanh(emb.reshape(B * S, H) @ params["enc_w"] + params["enc_b"])
    bert_outputs = enc.reshape(B, S, H)

    spans = offsets[:, :4].reshape(B, 2, 2)
    bidx = jnp.arange(B)
    x1 = bert_outputs[bidx, spans[:, 0, 0]]
    y1 = bert_outputs[bidx, spans[:, 0, 1]]
    x2 = bert_outputs[bidx, spans[:, 1, 0]]
    y2 = bert_outputs[bidx, spans[:, 1, 1]]
    g = bert_outputs[bidx, offsets[:, 4]]

    feat = jnp.concatenate([x1, y1, x1 * y1, x2, y2, x2 * y2, g], axis=-1)

    def bn(x, g_, b_, m_, v_):
        return (x - m_) * jax.lax.rsqrt(v_ + BN_EPS) * g_ + b_

    h = bn(feat, params["bn1_g"], params["bn1_b"], params["bn1_m"], params["bn1_v"])
    h = jax.nn.relu(h @ params["w1"] + params["b1"])
    h = bn(h, params["bn2_g"], params["bn2_b"], params["bn2_m"], params["bn2_v"])
    h = jax.nn.relu(h @ params["w2"] + params["b2"])
    h = bn(h, params["bn3_g"], params["bn3_b"], params["bn3_m"], params["bn3_v"])
    h = jax.nn.relu(h @ params["w3"] + params["b3"])
    h = bn(h, params["bn4_g"], params["bn4_b"], params["bn4_m"], params["bn4_v"])
    return h @ params["w4"] + params["b4"]


# ---------------------------------------------------------------------------
# Deterministic parameter initialization (mirrors Head.__init__):
#   Linear: kaiming_normal (fan_in) weights, zero bias; BatchNorm: weight=1,
#   bias=0, running_mean=0, running_var=1.
# ---------------------------------------------------------------------------
def init_params(key, vocab, S, H):
    ks = jax.random.split(key, 8)
    in1 = NUM_PIECES * H
    params = {
        "emb": jax.random.normal(ks[0], (vocab, H), jnp.float32) * 0.02,
        "pos": jax.random.normal(ks[1], (S, H), jnp.float32) * 0.02,
        "enc_w": jax.random.normal(ks[2], (H, H), jnp.float32) / math.sqrt(H),
        "enc_b": jnp.zeros((1, H), jnp.float32),
        # Linear weights stored [in, out].
        "w1": jax.random.normal(ks[3], (in1, FC_SIZE), jnp.float32)
              * math.sqrt(2.0 / in1),
        "b1": jnp.zeros((FC_SIZE,), jnp.float32),
        "w2": jax.random.normal(ks[4], (FC_SIZE, FC_SIZE), jnp.float32)
              * math.sqrt(2.0 / FC_SIZE),
        "b2": jnp.zeros((FC_SIZE,), jnp.float32),
        "w3": jax.random.normal(ks[5], (FC_SIZE, FC_SIZE), jnp.float32)
              * math.sqrt(2.0 / FC_SIZE),
        "b3": jnp.zeros((FC_SIZE,), jnp.float32),
        "w4": jax.random.normal(ks[6], (FC_SIZE, 3), jnp.float32)
              * math.sqrt(2.0 / FC_SIZE),
        "b4": jnp.zeros((3,), jnp.float32),
        # BatchNorm1d(7H) params (flat).
        "bn1_g": jnp.ones((in1,), jnp.float32),
        "bn1_b": jnp.zeros((in1,), jnp.float32),
        "bn1_m": jnp.zeros((in1,), jnp.float32),
        "bn1_v": jnp.ones((in1,), jnp.float32),
    }
    for i in (2, 3, 4):
        params[f"bn{i}_g"] = jnp.ones((FC_SIZE,), jnp.float32)
        params[f"bn{i}_b"] = jnp.zeros((FC_SIZE,), jnp.float32)
        params[f"bn{i}_m"] = jnp.zeros((FC_SIZE,), jnp.float32)
        params[f"bn{i}_v"] = jnp.ones((FC_SIZE,), jnp.float32)
    return params


if __name__ == "__main__":
    B, S, H, VOCAB = 2, 16, 32, 50
    key = jax.random.PRNGKey(0)
    pkey, tkey, okey = jax.random.split(key, 3)

    params = init_params(pkey, VOCAB, S, H)
    token_tensor = jax.random.randint(tkey, (B, S), 1, VOCAB, dtype=jnp.int32)
    offsets = jax.random.randint(okey, (B, 5), 0, S, dtype=jnp.int32)

    out = gap_model_forward(params, token_tensor, offsets)
    out = jax.block_until_ready(out)
    assert out.shape == (B, 3), out.shape

    ref = jax.block_until_ready(reference_forward(params, token_tensor, offsets))
    assert jnp.allclose(out, ref, atol=1e-4, rtol=1e-4), (out, ref)

    print("KERNEL_OK")
</pallas_src>

<mosaic_0001>
module attributes {stable_mosaic.version = 11 : i64} {
  func.func @_encoder_kernel(%arg0: i32, %arg1: memref<32x32xf32, #tpu.memory_space<vmem>>, %arg2: memref<32x32xf32, #tpu.memory_space<vmem>>, %arg3: memref<1x32xf32, #tpu.memory_space<vmem>>, %arg4: memref<32x32xf32, #tpu.memory_space<vmem>>) attributes {dimension_semantics = [#tpu.dimension_semantics<parallel>], iteration_bounds = array<i64: 1>, scalar_prefetch = 0 : i64, scratch_operands = 0 : i64, tpu.core_type = #tpu.core_type<tc>, window_params = [{transform_indices = @transform_0, window_bounds = array<i64: 32, 32>}, {pipeline_mode = #tpu.pipeline_mode<synchronous>, transform_indices = @transform_1, window_bounds = array<i64: 32, 32>}, {pipeline_mode = #tpu.pipeline_mode<synchronous>, transform_indices = @transform_2, window_bounds = array<i64: 1, 32>}, {transform_indices = @transform_3, window_bounds = array<i64: 32, 32>}]} {
    %c0 = arith.constant 0 : index
    %c0_0 = arith.constant 0 : index
    %0 = vector.load %arg1[%c0, %c0_0] : memref<32x32xf32, #tpu.memory_space<vmem>>, vector<32x32xf32>
    %c0_1 = arith.constant 0 : index
    %c0_2 = arith.constant 0 : index
    %1 = vector.load %arg2[%c0_1, %c0_2] : memref<32x32xf32, #tpu.memory_space<vmem>>, vector<32x32xf32>
    %cst = arith.constant dense<0.000000e+00> : vector<32x32xf32>
    %2 = tpu.matmul %0, %1, %cst {dimension_numbers = #tpu.dot_dimension_numbers<[1], [0], [0], [1], [0, 0, 1, 1], [], []>} : vector<32x32xf32>, vector<32x32xf32>, vector<32x32xf32> -> vector<32x32xf32>
    %c0_3 = arith.constant 0 : index
    %c0_4 = arith.constant 0 : index
    %3 = vector.load %arg3[%c0_3, %c0_4] : memref<1x32xf32, #tpu.memory_space<vmem>>, vector<1x32xf32>
    %4 = vector.broadcast %3 : vector<1x32xf32> to vector<32x32xf32>
    %5 = arith.addf %2, %4 : vector<32x32xf32>
    %6 = math.tanh %5 : vector<32x32xf32>
    %c0_5 = arith.constant 0 : index
    %c0_6 = arith.constant 0 : index
    %7 = vector.load %arg4[%c0_5, %c0_6] : memref<32x32xf32, #tpu.memory_space<vmem>>, vector<32x32xf32>
    tpu.vector_store %arg4[%c0_5, %c0_6], %6 {strides = array<i32>} : memref<32x32xf32, #tpu.memory_space<vmem>>, vector<32x32xf32>,
    return
  }
  func.func @transform_0(%arg0: i32) -> (i32, i32) {
    %c0_i32 = arith.constant 0 : i32
    %c0_i32_0 = arith.constant 0 : i32
    return %arg0, %c0_i32 : i32, i32
  }
  func.func @transform_1(%arg0: i32) -> (i32, i32) {
    %c0_i32 = arith.constant 0 : i32
    %c0_i32_0 = arith.constant 0 : i32
    %c0_i32_1 = arith.constant 0 : i32
    return %c0_i32, %c0_i32_0 : i32, i32
  }
  func.func @transform_2(%arg0: i32) -> (i32, i32) {
    %c0_i32 = arith.constant 0 : i32
    %c0_i32_0 = arith.constant 0 : i32
    %c0_i32_1 = arith.constant 0 : i32
    return %c0_i32, %c0_i32_0 : i32, i32
  }
  func.func @transform_3(%arg0: i32) -> (i32, i32) {
    %c0_i32 = arith.constant 0 : i32
    %c0_i32_0 = arith.constant 0 : i32
    return %arg0, %c0_i32 : i32, i32
  }
}

</mosaic_0001>

<bundles_post_ra>
// kernel: tpu_custom_call.1
= control target key start
LH: loop header
LB: loop body
LE: loop exit
PB: predicated region body
PF: predicated region fallthrough
CT: control target
= control target key end

     0   :  { %8 = vsyncpa [#allocation3], 0  ;;  %s291_s0 = inlined_call_operand.hbm [shape: f32[32,32], index: 0, kind: input, shape index: {}]   ;;  %s292_s1 = inlined_call_operand.hbm [shape: f32[32,32], index: 1, kind: input, shape index: {}]   ;;  %s293_s2 = inlined_call_operand.vmem [shape: f32[1,32], index: 2, kind: input, shape index: {}]   ;;  %s294_s3 = inlined_call_operand.hbm [shape: f32[32,32], index: 3, kind: output, shape index: {}]  }
   0x1   :  { %9 = vsyncpa [#allocation6], 0 }
   0x2   :  { %10 = vsyncpa [#allocation4], 0  ;;  %s15_s14 = sshll.u32 %s291_s0, 4  ;;  %s237_s15 = smov [#allocation2]   ;;  %s16_s14 = int_to_ptr.hbm [resolvable:$true] %s15_s14 }
   0x3   :  { %s17_s16 = sshll.u32 %s237_s15, 4  ;;  %s28_s19 = sshll.u32 %s292_s1, 4  ;;  %s18_s16 = int_to_ptr.vmem [resolvable:$true] %s17_s16  ;;  %s29_s19 = int_to_ptr.hbm [resolvable:$true] %s28_s19 }
   0x4   :  { %s238_s20 = smov 128   ;;  %s239_s21 = smov 8  }
   0x5   :  { %23 = dma.hbm_to_vmem [thread:$0]  %s16_s14, 512, %s18_s16, [#allocation3], %s238_s20, %s238_s20, %s239_s21  }
   0x6   :  { %s240_s22 = smov [#allocation5]  }
   0x7   :  { %s30_s23 = sshll.u32 %s240_s22, 4  ;;  %s31_s23 = int_to_ptr.vmem [resolvable:$true] %s30_s23 }
   0x8   :  { %36 = dma.hbm_to_vmem [thread:$0]  %s29_s19, 512, %s31_s23, [#allocation6], %s238_s20, %s238_s20, %s239_s21  }
   0x9   :  { %231 = dma.done.wait [#allocation3], 512  }
   0xa   :  { %232 = vsyncadd [#allocation3], 4294966784 }
   0xb   :  { %233 = dma.done.wait [#allocation6], 512  }
   0xc   :  { %234 = vsyncadd [#allocation6], 4294966784  ;;  %v54_v0 = vld [vmem:[#allocation5 + $0x18] sm:$0xff]  ;;  %v53_v1 = vld [vmem:[#allocation5 + $0x10] sm:$0xff]  ;;  %vm59_vm0 = vcmask 261120   ;;  %s241_s24 = smov [#allocation7]  }
   0xd   :  { %134 = vmatpush.msra.mxu2 %v54_v0  ;;  %135 = vmatpush.msra.mxu3 %v54_v0  ;;  %v52_v2 = vld [vmem:[#allocation5 + $0x8] sm:$0xff]  ;;  %v51_v3 = vld [vmem:[#allocation5] sm:$0xff]  ;;  %v49_v4 = vld [vmem:[#allocation2 + $0x10] sm:$0xff]  ;;  %s113_s25 = sshll.u32 %s241_s24, 4  ;;  %s115_s27 = sshll.u32 %s294_s3, 4  ;;  %s114_s25 = int_to_ptr.vmem [resolvable:$true] %s113_s25  ;;  %s116_s27 = int_to_ptr.hbm [resolvable:$true] %s115_s27 }
   0xe   :  { %84 = vmatpush.msra.mxu0 %v54_v0  ;;  %133 = vmatpush.msra.mxu1 %v54_v0  ;;  %v50_v5 = vld [vmem:[#allocation2 + $0x18] sm:$0xff]  ;;  %v47_v6 = vld [vmem:[#allocation2] sm:$0xff]  ;;  %v48_v7 = vld [vmem:[#allocation2 + $0x8] sm:$0xff] }
   0xf   :  { %137 = vmatpush.msra.mxu2 %v53_v1  ;;  %138 = vmatpush.msra.mxu3 %v53_v1  ;;  %v150_v8 = vld [vmem:[%s293_s2] ss:$0 sm:$0xff] }
  0x10   :  { %85 = vmatpush.msra.mxu0 %v53_v1  ;;  %136 = vmatpush.msra.mxu1 %v53_v1 }
  0x11   :  { %140 = vmatpush.msra.mxu2 %v52_v2  ;;  %141 = vmatpush.msra.mxu3 %v52_v2 }
  0x12   :  { %86 = vmatpush.msra.mxu0 %v52_v2  ;;  %139 = vmatpush.msra.mxu1 %v52_v2 }
  0x13   :  { %143 = vmatpush.msra.mxu2 %v51_v3  ;;  %144 = vmatpush.msra.mxu3 %v51_v3 }
  0x14   :  { %131 = vmatmul.msk.f32.vlgmr.msra.gmra.mxu2 %vm59_vm0, %v49_v4  ;;  %132 = vmatmul.msk.f32.vlgmr.msra.gmra.mxu3 %vm59_vm0, %v50_v5 }
  0x15   :  { %87 = vmatpush.msra.mxu0 %v51_v3  ;;  %142 = vmatpush.msra.mxu1 %v51_v3 }
  0x16   :  { %129 = vmatmul.msk.f32.vlgmr.msra.gmra.mxu0 %vm59_vm0, %v47_v6  ;;  %130 = vmatmul.msk.f32.vlgmr.msra.gmra.mxu1 %vm59_vm0, %v48_v7 }
  0x93   :  { %v89_v9 = vpop.f32.mrf.mxu0  ;;  %v92_v10 = vpop.f32.mrf.mxu1 }
  0x94   :  { %v90_v11 = vadd.f32 %v150_v8, %v89_v9  ;;  %v93_v12 = vadd.f32 %v150_v8, %v92_v10 }
  0x96   :  { %151 = vtanh.f32 %v90_v11 }
  0x97   :  { %153 = vtanh.f32 %v93_v12  ;;  %v95_v13 = vpop.f32.mrf.mxu2  ;;  %v98_v14 = vpop.f32.mrf.mxu3 }
  0x98   :  { %v96_v15 = vadd.f32 %v150_v8, %v95_v13  ;;  %v99_v16 = vadd.f32 %v150_v8, %v98_v14 }
  0x9a   :  { %155 = vtanh.f32 %v96_v15 }
  0x9b   :  { %157 = vtanh.f32 %v99_v16 }
  0x9c   :  { %v152_v17 = vpop.eup %151 }
  0x9d   :  { %v154_v18 = vpop.eup %153  ;;  %105 = vst.msk [vmem:[#allocation7] sm:$0xff] %vm59_vm0, %v152_v17 }
  0x9e   :  { %106 = vst.msk [vmem:[#allocation7 + $0x8] sm:$0xff] %vm59_vm0, %v154_v18 }
  0xa0   :  { %v156_v19 = vpop.eup %155 }
  0xa1   :  { %v158_v20 = vpop.eup %157  ;;  %107 = vst.msk [vmem:[#allocation7 + $0x10] sm:$0xff] %vm59_vm0, %v156_v19 }
  0xa2   :  { %108 = vst.msk [vmem:[#allocation7 + $0x18] sm:$0xff] %vm59_vm0, %v158_v20 }
  0xa3   :  { %121 = dma.vmem_to_hbm [thread:$0]  %s114_s25, 512, %s116_s27, [#allocation4], %s238_s20, %s238_s20, %s239_s21  }
  0xa4   :  { %235 = dma.done.wait [#allocation4], 512  }
  0xa5   :  { %236 = vsyncadd [#allocation4], 4294966784 }
  0xa6   :  { %126 = vsyncpa [#allocation3], 1 }
  0xa7   :  { %127 = vsyncpa [#allocation6], 1 }
  0xa8   :  { %128 = vsyncpa [#allocation4], 1 }

</bundles_post_ra>
